<compile_context>
chip_gen: v7x
topology: tpu7x:2x2x1
jax: 0.10.0
libtpu: 0.0.40
codegen_flags: <defaults>
</compile_context>

<pallas_src>
import functools

import jax
import jax.numpy as jnp
from jax.experimental import pallas as pl
from jax.experimental.pallas import tpu as pltpu


def _round_up(v, m):
    return ((v + m - 1) // m) * m


def _choose_tile_rows(n, d, target_bytes):
    """Rows per tile so one (rows, D) f32 slab is ~target_bytes, 128-aligned."""
    rows = max(128, (target_bytes // (4 * d)) // 128 * 128)
    if rows >= n:
        return n, 1                      # single tile == full array (always legal spec)
    return rows, int(pl.cdiv(n, rows))   # multi-tile: rows is a multiple of 128


def _logits_kernel(x_ref, w_ref, o_ref):
    """One grid step: logits for one row tile of x.

    x_ref: (tile_n, D) streamed slab of x (double-buffered by Pallas).
    w_ref: (1, D)      resident weight row.
    o_ref: (1, tile_n) lane-dense logit block for this tile.
    """
    # MXU contraction over D: (1, D) x (tile_n, D) -> (1, tile_n).
    # Lane-dense result, no cross-lane reduce / transpose on the XLU.
    o_ref[...] = jax.lax.dot_general(
        w_ref[...], x_ref[...],
        dimension_numbers=(((1,), (1,)), ((), ())),
        preferred_element_type=jnp.float32,
        precision=jax.lax.Precision.HIGHEST,
    ).astype(o_ref.dtype)


def _softmax_kernel(l_ref, b_ref, o_ref, *, n_rows):
    """Exact masked softmax over the (1, n_pad) logit row (single grid step)."""
    z = l_ref[...].astype(jnp.float32) + b_ref[...].astype(jnp.float32)
    if n_rows < z.shape[-1]:
        # Only the boundary tile can hold garbage (out-of-range) lanes; mask
        # them to -inf so they contribute nothing to max / sum.
        lane = jax.lax.broadcasted_iota(jnp.int32, z.shape, 1)
        z = jnp.where(lane < n_rows, z, -jnp.inf)
    m = jnp.max(z, axis=1, keepdims=True)     # (1, 1) global max
    e = jnp.exp(z - m)                        # masked lanes -> exp(-inf) = 0
    s = jnp.sum(e, axis=1, keepdims=True)     # (1, 1) denominator
    o_ref[...] = (e / s).astype(o_ref.dtype)  # exact division


def self_attention(x, weight, bias=None, *,
                   target_tile_bytes=2 * 1024 * 1024,
                   min_kernel_bytes=1 << 20):
    """Forward of SelfAttention: softmax(x @ weight.T + bias, axis=0) -> (N, 1).

    x: (N, D); weight: (1, D) torch Linear layout; bias: (1,) or None.
    Returns float32 scores of shape (N, 1).
    """
    n, d = x.shape
    w_row = weight.reshape(1, d).astype(x.dtype)
    b = jnp.zeros((1,), jnp.float32) if bias is None else jnp.asarray(bias).reshape(1)

    # Fast path: at toy sizes fixed pallas_call launch/DMA setup dominates and
    # plain XLA fusion is strictly faster.
    if n * d * x.dtype.itemsize < min_kernel_bytes:
        logits = jnp.dot(x.astype(jnp.float32), weight.reshape(1, d).astype(jnp.float32).T,
                         precision=jax.lax.Precision.HIGHEST) + b.astype(jnp.float32)
        return jax.nn.softmax(logits, axis=0)

    tile_n, num_tiles = _choose_tile_rows(n, d, target_tile_bytes)
    n_pad = tile_n * num_tiles

    tile_bytes = tile_n * d * 4
    vmem_limit = int(min(64 * 1024 * 1024,
                         max(32 * 1024 * 1024, 3 * tile_bytes + (2 << 20))))

    # Stage 1: streaming logits. x is read from HBM exactly once (no padding).
    logits = pl.pallas_call(
        _logits_kernel,
        out_shape=jax.ShapeDtypeStruct((1, n_pad), jnp.float32),
        grid=(num_tiles,),
        in_specs=[
            pl.BlockSpec((tile_n, d), lambda i: (i, 0)),   # streamed x row tiles
            pl.BlockSpec((1, d), lambda i: (0, 0)),        # resident weight row
        ],
        out_specs=pl.BlockSpec((1, tile_n), lambda i: (0, i)),  # lane-dense logits
        compiler_params=pltpu.CompilerParams(
            dimension_semantics=("parallel",),             # tiles are independent
            vmem_limit_bytes=vmem_limit,
        ),
    )(x, w_row)

    # Stage 2: exact masked softmax over the N logits (tiny, single step).
    probs = pl.pallas_call(
        functools.partial(_softmax_kernel, n_rows=n),
        out_shape=jax.ShapeDtypeStruct((1, n_pad), jnp.float32),
        grid=(1,),
        in_specs=[
            pl.BlockSpec((1, n_pad), lambda i: (0, 0)),
            pl.BlockSpec((1, 1), lambda i: (0, 0)),
        ],
        out_specs=pl.BlockSpec((1, n_pad), lambda i: (0, 0)),
    )(logits, b.reshape(1, 1).astype(jnp.float32))

    # Back to the (N, 1) layout of the torch module (float32 scores).
    return probs.reshape(-1)[:n].reshape(n, 1)


def init_params(key, dim):
    """Deterministic xavier_uniform_ for Linear(dim, 1) weight; zero bias."""
    fan_in, fan_out = dim, 1
    bound = (6.0 / (fan_in + fan_out)) ** 0.5
    weight = jax.random.uniform(key, (1, dim), jnp.float32, -bound, bound)
    bias = jnp.zeros((1,), jnp.float32)
    return weight, bias


if __name__ == "__main__":
    key = jax.random.PRNGKey(0)
    k_x, k_w, k_x2 = jax.random.split(key, 3)

    # Small shape matching the module: seq N=8 rows, hidden dim=32.
    N, DIM = 8, 32
    x = jax.random.normal(k_x, (N, DIM), jnp.float32)
    weight, bias = init_params(k_w, DIM)

    # Force the Pallas kernel path even at this toy size.
    scores = self_attention(x, weight, bias, min_kernel_bytes=0)
    jax.block_until_ready(scores)
    ref = jax.nn.softmax(x @ weight.T + bias, axis=0)
    assert scores.shape == (N, 1)
    assert jnp.allclose(scores, ref, atol=1e-3, rtol=1e-3)
    assert jnp.allclose(jnp.sum(scores), 1.0, atol=1e-3)

    # Default dispatch at toy sizes takes the XLA fast path; same numbers.
    fast = self_attention(x, weight, bias)
    assert jnp.allclose(fast, ref, atol=1e-3, rtol=1e-3)

    # Exercise the streaming multi-tile path with ragged N (3 tiles of 128 rows,
    # 84 out-of-range rows masked in the softmax stage).
    N2, DIM2 = 300, 128
    x2 = jax.random.normal(k_x2, (N2, DIM2), jnp.float32)
    w2, b2 = init_params(k_w, DIM2)
    s2 = self_attention(x2, w2, b2, target_tile_bytes=1 << 16, min_kernel_bytes=0)
    jax.block_until_ready(s2)
    ref2 = jax.nn.softmax(x2 @ w2.T + b2, axis=0)
    assert s2.shape == (N2, 1)
    assert jnp.allclose(s2, ref2, atol=1e-3, rtol=1e-3)
    assert jnp.allclose(jnp.sum(s2), 1.0, atol=1e-3)

    print("KERNEL_OK")
</pallas_src>

<mosaic_0001>
module attributes {stable_mosaic.version = 11 : i64} {
  func.func @_logits_kernel(%arg0: i32, %arg1: memref<8x32xf32, #tpu.memory_space<vmem>>, %arg2: memref<1x32xf32, #tpu.memory_space<vmem>>, %arg3: memref<1x8xf32, #tpu.memory_space<vmem>>) attributes {dimension_semantics = [#tpu.dimension_semantics<parallel>], iteration_bounds = array<i64: 1>, scalar_prefetch = 0 : i64, scratch_operands = 0 : i64, tpu.core_type = #tpu.core_type<tc>, window_params = [{transform_indices = @transform_0, window_bounds = array<i64: 8, 32>}, {pipeline_mode = #tpu.pipeline_mode<synchronous>, transform_indices = @transform_1, window_bounds = array<i64: 1, 32>}, {transform_indices = @transform_2, window_bounds = array<i64: 1, 8>}]} {
    %c0 = arith.constant 0 : index
    %c0_0 = arith.constant 0 : index
    %0 = vector.load %arg2[%c0, %c0_0] : memref<1x32xf32, #tpu.memory_space<vmem>>, vector<1x32xf32>
    %c0_1 = arith.constant 0 : index
    %c0_2 = arith.constant 0 : index
    %1 = vector.load %arg1[%c0_1, %c0_2] : memref<8x32xf32, #tpu.memory_space<vmem>>, vector<8x32xf32>
    %cst = arith.constant dense<0.000000e+00> : vector<1x8xf32>
    %2 = tpu.matmul %0, %1, %cst {dimension_numbers = #tpu.dot_dimension_numbers<[1], [1], [0], [0], [0, 0, 1, 0], [], []>, precision = #tpu.contract_precision<fp32>} : vector<1x32xf32>, vector<8x32xf32>, vector<1x8xf32> -> vector<1x8xf32>
    %c0_3 = arith.constant 0 : index
    %c0_4 = arith.constant 0 : index
    %3 = vector.load %arg3[%c0_3, %c0_4] : memref<1x8xf32, #tpu.memory_space<vmem>>, vector<1x8xf32>
    tpu.vector_store %arg3[%c0_3, %c0_4], %2 {strides = array<i32>} : memref<1x8xf32, #tpu.memory_space<vmem>>, vector<1x8xf32>,
    return
  }
  func.func @transform_0(%arg0: i32) -> (i32, i32) {
    %c0_i32 = arith.constant 0 : i32
    %c0_i32_0 = arith.constant 0 : i32
    return %arg0, %c0_i32 : i32, i32
  }
  func.func @transform_1(%arg0: i32) -> (i32, i32) {
    %c0_i32 = arith.constant 0 : i32
    %c0_i32_0 = arith.constant 0 : i32
    %c0_i32_1 = arith.constant 0 : i32
    return %c0_i32, %c0_i32_0 : i32, i32
  }
  func.func @transform_2(%arg0: i32) -> (i32, i32) {
    %c0_i32 = arith.constant 0 : i32
    %c0_i32_0 = arith.constant 0 : i32
    return %c0_i32, %arg0 : i32, i32
  }
}

</mosaic_0001>

<bundles_post_ra>
// kernel: tpu_custom_call.1
= control target key start
LH: loop header
LB: loop body
LE: loop exit
PB: predicated region body
PF: predicated region fallthrough
CT: control target
= control target key end

     0   :  { %7 = vsyncpa [#allocation3], 0  ;;  %s651_s0 = inlined_call_operand.hbm [shape: f32[8,32], index: 0, kind: input, shape index: {}]   ;;  %s652_s1 = inlined_call_operand.vmem [shape: f32[1,32], index: 1, kind: input, shape index: {}]   ;;  %s653_s2 = inlined_call_operand.hbm [shape: f32[1,8], index: 2, kind: output, shape index: {}]  }
   0x1   :  { %8 = vsyncpa [#allocation4], 0  ;;  %s599_s9 = smov [#allocation2]   ;;  %s551_s13 = scalar_lea.hbm %s651_s0, 128 }
   0x2   :  { %s15_s10 = sshll.u32 %s599_s9, 4  ;;  %p552_p0 = scmp.ne.s32.totalorder %s651_s0, %s551_s13  ;;  %s16_s10 = int_to_ptr.vmem [resolvable:$true] %s15_s10 }
   0x3   :  { %p555_p1 = scmp.lt.u32.totalorder %s551_s13, %s651_s0 }
   0x5   :  { %p557_p2 = pnand %p555_p1, %p552_p0 }
   0x7   :  { %560 = shalt.err (!%p557_p2)
}
   0x8   :  { %s561_s18 = scalar_lea.vmem %s16_s10, 128  ;;  %p566_p4 = scmp.lt.s32.totalorder %s16_s10, %s16_s10 }
   0x9   :  { %p562_p3 = scmp.ne.s32.totalorder %s16_s10, %s561_s18  ;;  %p567_p5 = scmp.lt.s32.totalorder %s561_s18, %s561_s18 }
   0xb   :  { %p568_p6 = por %p567_p5, %p566_p4 }
   0xd   :  { %p569_p7 = pnand %p568_p6, %p562_p3 }
   0xf   :  { %572 = shalt.err (!%p569_p7)
}
  0x10   :  { %18 = dma.hbm_to_vmem [thread:$0]  %s651_s0, 128, %s16_s10, [#allocation3]  }
  0x11   :  { %595 = dma.done.wait [#allocation3], 128  }
  0x12   :  { %596 = vsyncadd [#allocation3], 4294967168  ;;  %v600_v0 = vmov 0.0   ;;  %vm601_vm0 = vmmov 0   ;;  %vm26_vm1 = vcmask 261120   ;;  %v25_v1 = vld [vmem:[#allocation2] sm:$0xff] }
  0x13   :  { %523 = vmatprep.subr.mxu0 %v600_v0  ;;  %508 = vmatprep.subr.mxu1 %v600_v0  ;;  %v24_v2 = vld [vmem:[%s652_s1] sm:$0x1]  ;;  %v31_v3 = vsel %vm26_vm1, %v25_v1, 0  ;;  %s602_s0 = smov [#allocation5]   ;;  %vm479_vm2 = vcmask 57344  }
  0x14   :  { %525 = vmatprep.mubr.msk.f32.mxu0 %vm601_vm0, %v600_v0  ;;  %510 = vmatprep.mubr.msk.f32.mxu1 %vm601_vm0, %v600_v0  ;;  %v28_v4 = vsel %vm26_vm1, %v24_v2, 0  ;;  %v34_v5 = vand.u32 4294901760, %v31_v3  ;;  %s487_s1 = sshll.u32 %s602_s0, 4  ;;  %s488_s1 = int_to_ptr.vmem [resolvable:$true] %s487_s1 }
  0x15   :  { %v99_v6 = vand.u32 4294901760, %v28_v4  ;;  %s573_s23 = scalar_lea.vmem %s488_s1, 16  ;;  %s577_s24 = scalar_lea.vmem %s488_s1, 32 }
  0x16   :  { %v111_v7 = vsub.f32 %v31_v3, %v34_v5  ;;  %524 = vmatpush3.xpose.msra.mxu0 %v34_v5  ;;  %509 = vmatpush3.xpose.msra.mxu1 %v34_v5  ;;  %p574_p8 = scmp.ne.s32.totalorder %s488_s1, %s573_s23  ;;  %p578_p9 = scmp.lt.s32.totalorder %s488_s1, %s488_s1 }
  0x17   :  { %v100_v8 = vsub.f32 %v28_v4, %v99_v6  ;;  %513 = vmatprep.subr.mxu1 %v600_v0  ;;  %528 = vmatprep.subr.mxu0 %v600_v0  ;;  %p579_p10 = scmp.lt.s32.totalorder %s577_s24, %s573_s23 }
  0x18   :  { %v112_v10 = vand.u32 4294901760, %v111_v7 }
  0x19   :  { %v101_v9 = vand.u32 4294901760, %v100_v8  ;;  %p580_p11 = por %p579_p10, %p578_p9 }
  0x1a   :  { %v113_v12 = vsub.f32 %v111_v7, %v112_v10 }
  0x1b   :  { %526 = vmatmul.mubr.f32.vlgmr.msra.gmra.mrb[0].mxu0 %v101_v9  ;;  %v102_v11 = vsub.f32 %v100_v8, %v101_v9  ;;  %p581_p12 = pnand %p580_p11, %p574_p8 }
  0x1c   :  { %529 = vmatpush3.xpose.msra.mxu0 %v112_v10  ;;  %530 = vmatprep.mubr.msk.f32.mxu0 %vm601_vm0, %v600_v0  ;;  %v114_v14 = vand.u32 4294901760, %v113_v12 }
  0x1d   :  { %v103_v13 = vand.u32 4294901760, %v102_v11  ;;  %533 = vmatprep.subr.mxu0 %v600_v0 }
  0x1f   :  { %511 = vmatmul.mubr.f32.vlgmr.msra.gmra.mrb[0].mxu1 %v103_v13 }
  0x20   :  { %514 = vmatpush3.xpose.msra.mxu1 %v114_v14  ;;  %515 = vmatprep.mubr.msk.f32.mxu1 %vm601_vm0, %v600_v0 }
  0x21   :  { %518 = vmatprep.subr.mxu1 %v600_v0 }
  0x23   :  { %531 = vmatmul.mubr.f32.vlgmr.msra.gmra.mrb[0].mxu0 %v99_v6 }
  0x24   :  { %534 = vmatpush3.xpose.msra.mxu0 %v34_v5  ;;  %535 = vmatprep.mubr.msk.f32.mxu0 %vm601_vm0, %v600_v0 }
  0x27   :  { %516 = vmatmul.mubr.f32.vlgmr.msra.gmra.mrb[0].mxu1 %v99_v6 }
  0x28   :  { %519 = vmatpush3.xpose.msra.mxu1 %v111_v7  ;;  %520 = vmatprep.mubr.msk.f32.mxu1 %vm601_vm0, %v600_v0 }
  0x2b   :  { %536 = vmatmul.mubr.f32.vlgmr.msra.gmra.mrb[0].mxu0 %v99_v6 }
  0x2f   :  { %521 = vmatmul.mubr.f32.vlgmr.msra.gmra.mrb[0].mxu1 %v100_v8 }
  0xfe   :  { %v475_v15 = vpop.f32.mrb[0].mxu0 }
  0xff   :  { %v537_v16 = vpop.f32.mrb[1].mxu0 }
 0x102   :  { %v255_v17 = vpop.f32.mrb[0].mxu1 }
 0x103   :  { %v538_v18 = vadd.f32 %v475_v15, %v255_v17  ;;  %v522_v19 = vpop.f32.mrb[1].mxu1 }
 0x105   :  { %480 = vst.msk [vmem:[#allocation5] sm:$0x1] %vm479_vm2, %v538_v18 }
 0x106   :  { %584 = shalt.err (!%p581_p12)
}
 0x107   :  { %s585_s27 = scalar_lea.hbm %s653_s2, 16 }
 0x108   :  { %p586_p13 = scmp.ne.s32.totalorder %s653_s2, %s585_s27  ;;  %p589_p0 = scmp.lt.u32.totalorder %s585_s27, %s653_s2 }
 0x10a   :  { %p591_p1 = pnand %p589_p0, %p586_p13 }
 0x10c   :  { %594 = shalt.err (!%p591_p1)
}
 0x10d   :  { %490 = dma.vmem_to_hbm [thread:$0]  %s488_s1, 16, %s653_s2, [#allocation4]  }
 0x10e   :  { %597 = dma.done.wait [#allocation4], 16  }
 0x10f   :  { %598 = vsyncadd [#allocation4], 4294967280 }
 0x110   :  { %494 = vsyncpa [#allocation3], 1 }
 0x111   :  { %495 = vsyncpa [#allocation4], 1 }

</bundles_post_ra>
